<compile_context>
chip_gen: v6e
topology: v6e:2x2x1
jax: 0.10.0
libtpu: 0.0.40
codegen_flags: <defaults>
</compile_context>

<pallas_src>
import functools

import jax
import jax.numpy as jnp
from jax.experimental import pallas as pl
from jax.experimental.pallas import tpu as pltpu


def conv_bn_relu_kernel(x_ref, w_ref, scale_ref, shift_ref, o_ref, *, TH, K):
    """One (batch, row-tile, W-segment) per grid step.

    x_ref:     (1, 1, 1, TH+K-1, (Wseg+K-1)*Cin)  input band; W and Cin flattened into lanes
    w_ref:     (K, (Wseg+K-1)*Cin, Wseg*Cout)     block-Toeplitz weight (one slab per kh tap)
    scale_ref: (1, Wseg*Cout)                     folded BN scale, tiled over Wseg   (f32)
    shift_ref: (1, Wseg*Cout)                     folded BN shift, tiled over Wseg   (f32)
    o_ref:     (1, 1, TH, Wseg*Cout)              output tile; (w, cout) packed into lanes
    """
    n = o_ref.shape[-1]

    # One MXU matmul per kh tap; each LHS is a static sublane-offset slice of the ref
    # (no XLU lane relayout), accumulated in f32.
    acc = jnp.dot(x_ref[0, 0, 0, 0:TH, :], w_ref[0],
                  preferred_element_type=jnp.float32)
    for kh in range(1, K):
        acc = acc + jnp.dot(x_ref[0, 0, 0, kh:kh + TH, :], w_ref[kh],
                            preferred_element_type=jnp.float32)

    # Folded BatchNorm (eval) + ReLU in f32, fully lane-dense epilogue.
    y = jnp.maximum(acc * scale_ref[...] + shift_ref[...], 0.0)
    # TODO(synk): nn.Dropout(0.1) is identity in eval mode; train-mode dropout (in-kernel
    # pltpu.prng_seed / prng_random_bits masking) not implemented.
    o_ref[...] = y.reshape(1, 1, TH, n).astype(o_ref.dtype)


def _pick_tiles(h_out, w_out, c_out):
    # Row tile (matmul M dim): multiple of 16 (sublane/packing friendly for bf16 & f32),
    # capped so per-step tiles stay VMEM-cheap; non-divisor h_out handled by cdiv grid + pad.
    th = min(max(h_out, 1), 256)
    th = ((th + 15) // 16) * 16
    n_t = (h_out + th - 1) // th
    # W segment: pack Wseg output pixels' channels into the matmul N (lane) dim.  Largest
    # divisor of w_out with Wseg*Cout <= 512 keeps the Toeplitz weight small while making
    # the output lanes (and the HBM writeback) fully useful.
    wseg = 1
    for cand in range(1, w_out + 1):
        if w_out % cand == 0 and cand * c_out <= 512:
            wseg = cand
    n_w = w_out // wseg
    return th, n_t, wseg, n_w


def model_forward(x_nchw, w_oihw, gamma, beta, running_mean, running_var,
                  eps=1e-5, pad=1, compute_dtype=jnp.bfloat16):
    B, Cin, H, W = x_nchw.shape
    Cout, Cin_w, K, K2 = w_oihw.shape
    assert Cin_w == Cin and K == K2

    H_out = H + 2 * pad - K + 1
    W_out = W + 2 * pad - K + 1
    Hp, Wp = H + 2 * pad, W + 2 * pad

    TH, nT, Wseg, nW = _pick_tiles(H_out, W_out, Cout)
    band_h = TH + K - 1
    kdim = (Wseg + K - 1) * Cin        # per-tap matmul contraction dim
    N = Wseg * Cout                    # matmul N dim == packed output lanes

    # ---- input: NCHW -> NHWC, spatial zero-pad, cast; then band it so each grid step's
    # BlockSpec block is exactly the (TH+K-1)-row x (Wseg+K-1)-col window it needs.
    x_pad = jnp.pad(jnp.transpose(x_nchw, (0, 2, 3, 1)),
                    ((0, 0), (pad, pad), (pad, pad), (0, 0))).astype(compute_dtype)
    rows_needed = nT * TH + K - 1
    if rows_needed > Hp:               # non-divisor H_out: zero-pad rows, slice off after
        x_pad = jnp.pad(x_pad, ((0, 0), (0, rows_needed - Hp), (0, 0), (0, 0)))
    bands = []
    for t in range(nT):
        segs = []
        for ws in range(nW):
            blk = x_pad[:, t * TH:t * TH + band_h,
                        ws * Wseg:ws * Wseg + Wseg + K - 1, :]
            segs.append(blk.reshape(B, band_h, kdim))
        bands.append(jnp.stack(segs, axis=1))
    x_bands = jnp.stack(bands, axis=1)                 # (B, nT, nW, band_h, kdim)

    # ---- block-Toeplitz weight: w_toep[kh, p*Cin+ci, w*Cout+co] = W[kh, p-w, ci, co]
    wk = jnp.transpose(w_oihw, (2, 3, 1, 0)).astype(jnp.float32)          # (K, K, Cin, Cout)
    sel = (jnp.arange(Wseg)[:, None, None] + jnp.arange(K)[None, :, None]
           == jnp.arange(Wseg + K - 1)[None, None, :]).astype(jnp.float32)  # (Wseg, K, Wseg+K-1)
    w_toep = jnp.einsum('wkp,hkio->hpiwo', sel, wk)     # (K, Wseg+K-1, Cin, Wseg, Cout)
    w_toep = w_toep.reshape(K, kdim, N).astype(compute_dtype)

    # ---- folded BN (eval), tiled over the packed (w, cout) lane layout, kept in f32.
    inv_std = jax.lax.rsqrt(running_var.astype(jnp.float32) + eps)
    scale = gamma.astype(jnp.float32) * inv_std
    shift = beta.astype(jnp.float32) - running_mean.astype(jnp.float32) * scale
    scale_t = jnp.tile(scale, Wseg).reshape(1, N)
    shift_t = jnp.tile(shift, Wseg).reshape(1, N)

    itemsize = jnp.dtype(compute_dtype).itemsize
    cost = pl.CostEstimate(
        flops=2 * B * nT * TH * nW * K * kdim * N,
        transcendentals=0,
        bytes_accessed=int(x_bands.size * itemsize + w_toep.size * itemsize
                           + 2 * N * 4 + B * nW * nT * TH * N * itemsize))

    out = pl.pallas_call(
        functools.partial(conv_bn_relu_kernel, TH=TH, K=K),
        out_shape=jax.ShapeDtypeStruct((B, nW, nT * TH, N), compute_dtype),
        grid=(B, nT, nW),
        in_specs=[
            pl.BlockSpec((1, 1, 1, band_h, kdim), lambda b, t, w: (b, t, w, 0, 0)),
            pl.BlockSpec((K, kdim, N), lambda b, t, w: (0, 0, 0)),
            pl.BlockSpec((1, N), lambda b, t, w: (0, 0)),
            pl.BlockSpec((1, N), lambda b, t, w: (0, 0)),
        ],
        out_specs=pl.BlockSpec((1, 1, TH, N), lambda b, t, w: (b, w, t, 0)),
        compiler_params=pltpu.CompilerParams(
            dimension_semantics=("parallel", "parallel", "parallel"),
            vmem_limit_bytes=64 * 1024 * 1024),
        cost_estimate=cost,
    )(x_bands, w_toep, scale_t, shift_t)

    # Single pass over the compact compute_dtype result: drop padded rows, unpack the
    # (w, cout) lanes, and go to the module's NCHW layout in one transpose.
    out = out[:, :, :H_out, :].reshape(B, nW, H_out, Wseg, Cout)
    out = jnp.transpose(out, (0, 4, 2, 1, 3)).reshape(B, Cout, H_out, W_out)
    return out


def reference_forward(x_nchw, w_oihw, gamma, beta, running_mean, running_var,
                      eps=1e-5, pad=1):
    y = jax.lax.conv_general_dilated(
        x_nchw, w_oihw, window_strides=(1, 1), padding=((pad, pad), (pad, pad)),
        dimension_numbers=("NCHW", "OIHW", "NCHW"))
    inv_std = 1.0 / jnp.sqrt(running_var + eps)
    y = (y - running_mean[None, :, None, None]) * (gamma * inv_std)[None, :, None, None] \
        + beta[None, :, None, None]
    return jnp.maximum(y, 0.0)


if __name__ == "__main__":
    key = jax.random.PRNGKey(0)
    k_x, k_w, k_g, k_b, k_m, k_v = jax.random.split(key, 6)

    B, Cin, Cout, H, W, K = 2, 4, 8, 16, 16, 3

    x = jax.random.normal(k_x, (B, Cin, H, W), dtype=jnp.float32)
    # Deterministic parameter init (synthetic, not a checkpoint load).
    w = jax.random.normal(k_w, (Cout, Cin, K, K), dtype=jnp.float32) * 0.1
    gamma = 1.0 + 0.1 * jax.random.normal(k_g, (Cout,), dtype=jnp.float32)
    beta = 0.1 * jax.random.normal(k_b, (Cout,), dtype=jnp.float32)
    running_mean = 0.1 * jax.random.normal(k_m, (Cout,), dtype=jnp.float32)
    running_var = jnp.abs(jax.random.normal(k_v, (Cout,), dtype=jnp.float32)) + 0.5

    ref = reference_forward(x, w, gamma, beta, running_mean, running_var)

    # Strict-precision path (f32 operands, f32 output) — matches the PyTorch module closely.
    out_f32 = jax.block_until_ready(
        model_forward(x, w, gamma, beta, running_mean, running_var,
                      compute_dtype=jnp.float32))
    assert out_f32.shape == (B, Cout, H, W), out_f32.shape
    assert jnp.allclose(out_f32, ref, atol=1e-4, rtol=1e-4), \
        float(jnp.max(jnp.abs(out_f32 - ref)))

    # Fast path: bf16 MXU operands + bf16 output storage, f32 accumulate + f32 BN/ReLU.
    out_bf16 = jax.block_until_ready(
        model_forward(x, w, gamma, beta, running_mean, running_var,
                      compute_dtype=jnp.bfloat16))
    assert out_bf16.shape == (B, Cout, H, W), out_bf16.shape
    assert jnp.allclose(out_bf16, ref, atol=5e-2, rtol=5e-2), \
        float(jnp.max(jnp.abs(out_bf16.astype(jnp.float32) - ref)))

    print("KERNEL_OK")
</pallas_src>

<mosaic_0001>
module attributes {stable_mosaic.version = 11 : i64} {
  func.func @conv_bn_relu_kernel(%arg0: i32, %arg1: i32, %arg2: i32, %arg3: memref<1x1x1x18x72xf32, #tpu.memory_space<vmem>>, %arg4: memref<3x72x128xf32, #tpu.memory_space<vmem>>, %arg5: memref<1x128xf32, #tpu.memory_space<vmem>>, %arg6: memref<1x128xf32, #tpu.memory_space<vmem>>, %arg7: memref<1x1x16x128xf32, #tpu.memory_space<vmem>>) attributes {dimension_semantics = [#tpu.dimension_semantics<parallel>, #tpu.dimension_semantics<parallel>, #tpu.dimension_semantics<parallel>], iteration_bounds = array<i64: 2, 1, 1>, scalar_prefetch = 0 : i64, scratch_operands = 0 : i64, tpu.core_type = #tpu.core_type<tc>, window_params = [{transform_indices = @transform_0, window_bounds = array<i64: 1, 1, 1, 18, 72>}, {pipeline_mode = #tpu.pipeline_mode<synchronous>, transform_indices = @transform_1, window_bounds = array<i64: 3, 72, 128>}, {pipeline_mode = #tpu.pipeline_mode<synchronous>, transform_indices = @transform_2, window_bounds = array<i64: 1, 128>}, {pipeline_mode = #tpu.pipeline_mode<synchronous>, transform_indices = @transform_3, window_bounds = array<i64: 1, 128>}, {transform_indices = @transform_4, window_bounds = array<i64: 1, 1, 16, 128>}]} {
    %c0 = arith.constant 0 : index
    %c0_0 = arith.constant 0 : index
    %c0_1 = arith.constant 0 : index
    %c0_2 = arith.constant 0 : index
    %c0_3 = arith.constant 0 : index
    %0 = vector.load %arg3[%c0, %c0_0, %c0_1, %c0_2, %c0_3] : memref<1x1x1x18x72xf32, #tpu.memory_space<vmem>>, vector<1x1x1x16x72xf32>
    %1 = vector.shape_cast %0 : vector<1x1x1x16x72xf32> to vector<16x72xf32>
    %c0_4 = arith.constant 0 : index
    %c0_5 = arith.constant 0 : index
    %c0_6 = arith.constant 0 : index
    %2 = vector.load %arg4[%c0_4, %c0_5, %c0_6] : memref<3x72x128xf32, #tpu.memory_space<vmem>>, vector<1x72x128xf32>
    %3 = vector.shape_cast %2 : vector<1x72x128xf32> to vector<72x128xf32>
    %cst = arith.constant dense<0.000000e+00> : vector<16x128xf32>
    %4 = tpu.matmul %1, %3, %cst {dimension_numbers = #tpu.dot_dimension_numbers<[1], [0], [0], [1], [0, 0, 1, 1], [], []>} : vector<16x72xf32>, vector<72x128xf32>, vector<16x128xf32> -> vector<16x128xf32>
    %c0_7 = arith.constant 0 : index
    %c0_8 = arith.constant 0 : index
    %c0_9 = arith.constant 0 : index
    %c1 = arith.constant 1 : index
    %c0_10 = arith.constant 0 : index
    %5 = vector.load %arg3[%c0_7, %c0_8, %c0_9, %c1, %c0_10] : memref<1x1x1x18x72xf32, #tpu.memory_space<vmem>>, vector<1x1x1x16x72xf32>
    %6 = vector.shape_cast %5 : vector<1x1x1x16x72xf32> to vector<16x72xf32>
    %c1_11 = arith.constant 1 : index
    %c0_12 = arith.constant 0 : index
    %c0_13 = arith.constant 0 : index
    %7 = vector.load %arg4[%c1_11, %c0_12, %c0_13] : memref<3x72x128xf32, #tpu.memory_space<vmem>>, vector<1x72x128xf32>
    %8 = vector.shape_cast %7 : vector<1x72x128xf32> to vector<72x128xf32>
    %cst_14 = arith.constant dense<0.000000e+00> : vector<16x128xf32>
    %9 = tpu.matmul %6, %8, %cst_14 {dimension_numbers = #tpu.dot_dimension_numbers<[1], [0], [0], [1], [0, 0, 1, 1], [], []>} : vector<16x72xf32>, vector<72x128xf32>, vector<16x128xf32> -> vector<16x128xf32>
    %10 = arith.addf %4, %9 : vector<16x128xf32>
    %c0_15 = arith.constant 0 : index
    %c0_16 = arith.constant 0 : index
    %c0_17 = arith.constant 0 : index
    %c2 = arith.constant 2 : index
    %c0_18 = arith.constant 0 : index
    %11 = vector.load %arg3[%c0_15, %c0_16, %c0_17, %c2, %c0_18] : memref<1x1x1x18x72xf32, #tpu.memory_space<vmem>>, vector<1x1x1x16x72xf32>
    %12 = vector.shape_cast %11 : vector<1x1x1x16x72xf32> to vector<16x72xf32>
    %c2_19 = arith.constant 2 : index
    %c0_20 = arith.constant 0 : index
    %c0_21 = arith.constant 0 : index
    %13 = vector.load %arg4[%c2_19, %c0_20, %c0_21] : memref<3x72x128xf32, #tpu.memory_space<vmem>>, vector<1x72x128xf32>
    %14 = vector.shape_cast %13 : vector<1x72x128xf32> to vector<72x128xf32>
    %cst_22 = arith.constant dense<0.000000e+00> : vector<16x128xf32>
    %15 = tpu.matmul %12, %14, %cst_22 {dimension_numbers = #tpu.dot_dimension_numbers<[1], [0], [0], [1], [0, 0, 1, 1], [], []>} : vector<16x72xf32>, vector<72x128xf32>, vector<16x128xf32> -> vector<16x128xf32>
    %16 = arith.addf %10, %15 : vector<16x128xf32>
    %c0_23 = arith.constant 0 : index
    %c0_24 = arith.constant 0 : index
    %17 = vector.load %arg5[%c0_23, %c0_24] : memref<1x128xf32, #tpu.memory_space<vmem>>, vector<1x128xf32>
    %18 = vector.broadcast %17 : vector<1x128xf32> to vector<16x128xf32>
    %19 = arith.mulf %16, %18 : vector<16x128xf32>
    %c0_25 = arith.constant 0 : index
    %c0_26 = arith.constant 0 : index
    %20 = vector.load %arg6[%c0_25, %c0_26] : memref<1x128xf32, #tpu.memory_space<vmem>>, vector<1x128xf32>
    %21 = vector.broadcast %20 : vector<1x128xf32> to vector<16x128xf32>
    %22 = arith.addf %19, %21 : vector<16x128xf32>
    %cst_27 = arith.constant 0.000000e+00 : f32
    %23 = vector.broadcast %cst_27 : f32 to vector<16x128xf32>
    %24 = arith.maximumf %22, %23 : vector<16x128xf32>
    %25 = vector.shape_cast %24 : vector<16x128xf32> to vector<1x1x16x128xf32>
    %c0_28 = arith.constant 0 : index
    %c0_29 = arith.constant 0 : index
    %c0_30 = arith.constant 0 : index
    %c0_31 = arith.constant 0 : index
    %26 = vector.load %arg7[%c0_28, %c0_29, %c0_30, %c0_31] : memref<1x1x16x128xf32, #tpu.memory_space<vmem>>, vector<1x1x16x128xf32>
    tpu.vector_store %arg7[%c0_28, %c0_29, %c0_30, %c0_31], %25 {strides = array<i32>} : memref<1x1x16x128xf32, #tpu.memory_space<vmem>>, vector<1x1x16x128xf32>,
    return
  }
  func.func @transform_0(%arg0: i32, %arg1: i32, %arg2: i32) -> (i32, i32, i32, i32, i32) {
    %c0_i32 = arith.constant 0 : i32
    %c0_i32_0 = arith.constant 0 : i32
    %c0_i32_1 = arith.constant 0 : i32
    return %arg0, %arg1, %arg2, %c0_i32, %c0_i32_0 : i32, i32, i32, i32, i32
  }
  func.func @transform_1(%arg0: i32, %arg1: i32, %arg2: i32) -> (i32, i32, i32) {
    %c0_i32 = arith.constant 0 : i32
    %c0_i32_0 = arith.constant 0 : i32
    %c0_i32_1 = arith.constant 0 : i32
    %c0_i32_2 = arith.constant 0 : i32
    return %c0_i32, %c0_i32_0, %c0_i32_1 : i32, i32, i32
  }
  func.func @transform_2(%arg0: i32, %arg1: i32, %arg2: i32) -> (i32, i32) {
    %c0_i32 = arith.constant 0 : i32
    %c0_i32_0 = arith.constant 0 : i32
    %c0_i32_1 = arith.constant 0 : i32
    return %c0_i32, %c0_i32_0 : i32, i32
  }
  func.func @transform_3(%arg0: i32, %arg1: i32, %arg2: i32) -> (i32, i32) {
    %c0_i32 = arith.constant 0 : i32
    %c0_i32_0 = arith.constant 0 : i32
    %c0_i32_1 = arith.constant 0 : i32
    return %c0_i32, %c0_i32_0 : i32, i32
  }
  func.func @transform_4(%arg0: i32, %arg1: i32, %arg2: i32) -> (i32, i32, i32, i32) {
    %c0_i32 = arith.constant 0 : i32
    %c0_i32_0 = arith.constant 0 : i32
    return %arg0, %arg2, %arg1, %c0_i32 : i32, i32, i32, i32
  }
}

</mosaic_0001>

<bundles_post_ra>
// kernel: tpu_custom_call.1
= control target key start
LH: loop header
LB: loop body
LE: loop exit
PB: predicated region body
PF: predicated region fallthrough
CT: control target
= control target key end

     0   :  { %9 = vsyncpa [#allocation3], 0  ;;  %s1175_s0 = inlined_call_operand.vmem [shape: f32[2,1,1,18,72], index: 0, kind: input, shape index: {}]   ;;  %s1176_s1 = inlined_call_operand.hbm [shape: f32[3,72,128], index: 1, kind: input, shape index: {}]   ;;  %s1177_s2 = inlined_call_operand.vmem [shape: f32[1,128], index: 2, kind: input, shape index: {}]   ;;  %s1178_s3 = inlined_call_operand.vmem [shape: f32[1,128], index: 3, kind: input, shape index: {}]   ;;  %s1179_s4 = inlined_call_operand.hbm [shape: f32[2,1,16,128], index: 4, kind: output, shape index: {}]  }
   0x1   :  { %10 = vsyncpa [#allocation4], 0 }
   0x2   :  { %12 = vsyncpa [#allocation4 + $0x1], 0  ;;  %s1018_s15 = smov 0   ;;  %s1020_s16 = smov 0  }
   0x3   :  { %s1022_s17 = smov 0   ;;  %s1024_s18 = smov 0  }
   0x4   :  { %s1026_s19 = smov 0   ;;  %s1028_s20 = smov 0  }
   0x5 LB: > { %s689_s21 = sadd.s32 4294967295, %s985_s20   ;;  %s690_s22 = sadd.s32 4294967294, %s985_s20   ;;  %s985_s20 = sphi %s1028_s20, %s18_s20   ;;  %s981_s19 = sphi %s1026_s19, %s1188_s19   ;;  %s977_s18 = sphi %s1024_s18, %s1187_s18   ;;  %s973_s17 = sphi %s1022_s17, %s1186_s17   ;;  %s969_s16 = sphi %s1020_s16, %s1185_s16   ;;  %s965_s15 = sphi %s1018_s15, %s1184_s15  }
   0x6   : > { %s37_s23 = sadd.s32 1, %s981_s19  ;;  %s141_s24 = sadd.s32 1, %s973_s17 }
   0x7   : > { %p39_p0 = scmp.ge.s32.totalorder %s37_s23, 2  ;;  %p151_p1 = scmp.ne.s32.totalorder %s973_s17, %s969_s16 }
   0x8   : > { %p152_p2 = scmp.eq.s32.totalorder %s689_s21, 1  ;;  %p157_p3 = scmp.ne.s32.totalorder %s969_s16, %s965_s15 }
   0x9   : > { %s1190_s23 = smov (%p39_p0, %s37_s23), 0  ;;  %p158_p5 = scmp.eq.s32.totalorder %s690_s22, 1 }
   0xa   : > { %p1058_p4 = por %p152_p2, %p151_p1  ;;  %s134_s26 = ssub.s32 %s981_s19, %s1190_s23 }
   0xb   : > { %p691_p6 = scmp.ge.s32.totalorder %s985_s20, 1  ;;  %p139_p7 = scmp.eq.s32.totalorder %s134_s26, 0 }
   0xc   : > { %p1065_p8 = por %p158_p5, %p157_p3  ;;  %p165_p9 = scmp.lt.s32.totalorder %s985_s20, 3 }
   0xd   : > { %s1071_s28 = scalar_select %p139_p7, %s973_s17, %s141_s24  }
   0xe   : > { %p1073_p10 = pnand %p691_p6, %p165_p9  ;;  %p1077_p11 = scmp.eq.s32.totalorder %s689_s21, 0 }
   0xf   : > { %s987_s5 = smov [#allocation2]  }
  0x10   : > { %p815_p12 = pneg %p1073_p10  ;;  %s177_s6 = sshll.u32 %s987_s5, 4  ;;  %s178_s6 = int_to_ptr.vmem [resolvable:$true] %s177_s6 }
  0x11   : > { %s890_s7 = scalar_lea.vmem %s178_s6, 3456  ;;  %p898_p5 = scmp.lt.s32.totalorder %s178_s6, %s178_s6 }
  0x12   : > { %p816_p13 = pnand %p1077_p11, %p815_p12  ;;  %p891_p1 = scmp.ne.s32.totalorder %s178_s6, %s890_s7 }
  0x13   : > { %p899_p6 = scmp.lt.s32.totalorder %s890_s7, %s890_s7 }
  0x14   : > { %p881_p0 = pneg %p816_p13 }
  0x15   : > { %p900_p7 = por %p899_p6, %p898_p5 }
  0x16   : > { %p893_p2 = pnand %p891_p1, %p881_p0 }
  0x18   : > { %p894_p3 = pneg %p893_p2 }
  0x1a   : > { %p901_p9 = pnand %p900_p7, %p894_p3 }
  0x1c   : > { %904 = shalt.err (!%p901_p9)
}
  0x1d   : > { %s988_s8 = smov 128   ;;  %s989_s9 = smov 8  }
  0x1e   : > { %818 = dma.hbm_to_vmem [thread:$0]  (!%p816_p13), %s1176_s1, 3456, %s178_s6, [#allocation3], %s988_s8, %s988_s8, %s989_s9  }
  0x1f   : > { %215 = sbr.rel (%p1073_p10) target bundleno = 293 (0x125), region = 36 }
  0x24   : > { %956 = dma.done.wait (%p1077_p11), [#allocation3], 3456  }
  0x25   : > { %958 = vsyncadd (%p1077_p11), [#allocation3], 4294963840  ;;  %v285_v0 = vld [vmem:[#allocation2 + $0x88] sm:$0xff]  ;;  %v273_v1 = vld [vmem:[#allocation2 + $0x40] sm:$0xff]  ;;  %p249_p12 = scmp.lt.s32.totalorder %s977_s18, 1  ;;  %vm286_vm0 = vcmask 588800  }
  0x26   : > { %v284_v2 = vld [vmem:[#allocation2 + $0x80] sm:$0xff]  ;;  %745 = vmatprep.subr.mxu0 %v285_v0  ;;  %766 = vmatprep.subr.mxu1 %v273_v1  ;;  %v272_v3 = vld [vmem:[#allocation2 + $0x38] sm:$0xff]  ;;  %v271_v5 = vld [vmem:[#allocation2 + $0x30] sm:$0xff]  ;;  %s246_s24 = sand.u32 1, %s969_s16   ;;  %s711_s9 = sshll.u32 %s977_s18, 8 }
  0x27   : > { %746 = vmatpush3.msra.mxu0 %v285_v0  ;;  %767 = vmatpush3.msra.mxu1 %v273_v1  ;;  %v283_v4 = vld [vmem:[#allocation2 + $0x78] sm:$0xff]  ;;  %v282_v6 = vld [vmem:[#allocation2 + $0x70] sm:$0xff]  ;;  %v270_v7 = vld [vmem:[#allocation2 + $0x28] sm:$0xff]  ;;  %s250_s12 = scalar_select %p249_p12, %s977_s18, 1 }
  0x28   : > { %747 = vmatprep.subr.mxu0 %v284_v2  ;;  %768 = vmatprep.subr.mxu1 %v272_v3  ;;  %v281_v8 = vld [vmem:[#allocation2 + $0x68] sm:$0xff]  ;;  %v269_v9 = vld [vmem:[#allocation2 + $0x20] sm:$0xff]  ;;  %v268_v11 = vld [vmem:[#allocation2 + $0x18] sm:$0xff]  ;;  %s696_s26 = sshll.u32 %s246_s24, 4  ;;  %s990_s18 = smov [#allocation5]  }
  0x29   : > { %748 = vmatpush3.msra.mxu0 %v284_v2  ;;  %769 = vmatpush3.msra.mxu1 %v272_v3  ;;  %v280_v10 = vld [vmem:[#allocation2 + $0x60] sm:$0xff]  ;;  %s808_s13 = smul.u32 24, %s250_s12  ;;  %v279_v12 = vld [vmem:[#allocation2 + $0x58] sm:$0xff]  ;;  %v267_v13 = vld [vmem:[#allocation2 + $0x10] sm:$0xff]  ;;  %s248_s7 = scalar_lea.vmem [#allocation5], %s696_s26 }
  0x2a   : > { %749 = vmatprep.subr.mxu0 %v283_v4  ;;  %770 = vmatprep.subr.mxu1 %v271_v5  ;;  %v278_v14 = vld [vmem:[#allocation2 + $0x50] sm:$0xff]  ;;  %v266_v15 = vld [vmem:[#allocation2 + $0x8] sm:$0xff]  ;;  %v265_v17 = vld [vmem:[#allocation2] sm:$0xff]  ;;  %s584_s8 = sshll.u32 %s248_s7, 4  ;;  %s1128_s12 = scalar_lea.hbm %s1179_s4, %s711_s9  ;;  %s1123_s8 = int_to_ptr.vmem [resolvable:$true] %s584_s8 }
  0x2b   : > { %750 = vmatpush3.msra.mxu0 %v283_v4  ;;  %771 = vmatpush3.msra.mxu1 %v271_v5  ;;  %s1101_s22 = scalar_lea.vmem %s1175_s0, %s808_s13  ;;  %v277_v16 = vld [vmem:[#allocation2 + $0x48] sm:$0xff]  ;;  %v460_v22 = vld [vmem:[#allocation2 + $0xd0] sm:$0xff]  ;;  %v458_v25 = vld [vmem:[#allocation2 + $0xc0] sm:$0xff]  ;;  %s1130_s13 = scalar_lea.sflag [#allocation4], %s246_s24 }
  0x2c   : > { %751 = vmatprep.subr.mxu0 %v282_v6  ;;  %772 = vmatprep.subr.mxu1 %v270_v7  ;;  %v274_v18 = vld [vmem:[%s1101_s22 + $0x1] sm:$0xff]  ;;  %v275_v20 = vld [vmem:[%s1101_s22 + $0x9] sm:$0xff]  ;;  %v457_v26 = vld [vmem:[#allocation2 + $0xb8] sm:$0xff]  ;;  %s905_s14 = scalar_lea.vmem %s1123_s8, 256  ;;  %s909_s21 = sshll.u32 %s990_s18, 4  ;;  %s910_s21 = int_to_ptr.vmem [resolvable:$false] %s909_s21 }
  0x2d   : > { %752 = vmatpush3.msra.mxu0 %v282_v6  ;;  %773 = vmatpush3.msra.mxu1 %v270_v7  ;;  %v263_v19 = vld [vmem:[%s1101_s22] sm:$0xff]  ;;  %v264_v21 = vld [vmem:[%s1101_s22 + $0x8] sm:$0xff]  ;;  %v456_v27 = vld [vmem:[#allocation2 + $0xb0] sm:$0xff]  ;;  %p906_p10 = scmp.ne.s32.totalorder %s1123_s8, %s905_s14  ;;  %p912_p0 = scmp.lt.s32.totalorder %s1123_s8, %s910_s21 }
  0x2e   : > { %753 = vmatprep.subr.mxu0 %v281_v8  ;;  %774 = vmatprep.subr.mxu1 %v269_v9  ;;  %v449_v23 = vld [vmem:[%s1101_s22 + $0x2] sm:$0xff]  ;;  %v453_v30 = vld [vmem:[#allocation2 + $0x98] sm:$0xff]  ;;  %v452_v31 = vld [vmem:[#allocation2 + $0x90] sm:$0xff] }
  0x2f   : > { %754 = vmatpush3.msra.mxu0 %v281_v8  ;;  %775 = vmatpush3.msra.mxu1 %v269_v9  ;;  %v459_v24 = vld [vmem:[#allocation2 + $0xc8] sm:$0xff]  ;;  %v454_v29 = vld [vmem:[#allocation2 + $0xa0] sm:$0xff]  ;;  %p907_p11 = pnand %p906_p10, %p1058_p4 }
  0x30   : > { %755 = vmatprep.subr.mxu0 %v280_v10  ;;  %776 = vmatprep.subr.mxu1 %v268_v11  ;;  %v455_v28 = vld [vmem:[#allocation2 + $0xa8] sm:$0xff]  ;;  %v704_v39 = vld [vmem:[%s1177_s2] ss:$0 sm:$0xff] }
  0x31   : > { %756 = vmatpush3.msra.mxu0 %v280_v10  ;;  %777 = vmatpush3.msra.mxu1 %v268_v11  ;;  %v450_v32 = vld [vmem:[%s1101_s22 + $0xa] sm:$0xff]  ;;  %v705_v42 = vld [vmem:[%s1178_s3] ss:$0 sm:$0xff]  ;;  %p908_p13 = pneg %p907_p11  ;;  %s911_s22 = scalar_lea.vmem %s910_s21, 512 }
  0x32   : > { %757 = vmatprep.subr.mxu0 %v279_v12  ;;  %778 = vmatprep.subr.mxu1 %v267_v13  ;;  %p913_p1 = scmp.lt.s32.totalorder %s911_s22, %s905_s14 }
  0x33   : > { %758 = vmatpush3.msra.mxu0 %v279_v12  ;;  %779 = vmatpush3.msra.mxu1 %v267_v13 }
  0x34   : > { %759 = vmatprep.subr.mxu0 %v278_v14  ;;  %780 = vmatprep.subr.mxu1 %v266_v15  ;;  %p914_p2 = por %p913_p1, %p912_p0 }
  0x35   : > { %760 = vmatpush3.msra.mxu0 %v278_v14  ;;  %781 = vmatpush3.msra.mxu1 %v266_v15 }
  0x36   : > { %761 = vmatprep.subr.mxu0 %v277_v16  ;;  %782 = vmatprep.subr.mxu1 %v265_v17  ;;  %p915_p3 = pnand %p914_p2, %p908_p13 }
  0x37   : > { %762 = vmatpush3.msra.mxu0 %v277_v16  ;;  %763 = vmatprep.mubr.msk.f32.mxu0 %vm286_vm0, %v274_v18 }
  0x38   : > { %783 = vmatpush3.msra.mxu1 %v265_v17  ;;  %784 = vmatprep.mubr.msk.f32.mxu1 %vm286_vm0, %v263_v19 }
  0x39   : > { %764 = vmatmul.mubr.msk.f32.vlgmr.msra.gmra.mxu0 %vm286_vm0, %v275_v20  ;;  %785 = vmatmul.mubr.msk.f32.vlgmr.msra.gmra.mxu1 %vm286_vm0, %v264_v21 }
  0x3a   : > { %787 = vmatprep.subr.mxu0 %v460_v22  ;;  %805 = vmatprep.mubr.msk.f32.mxu0 %vm286_vm0, %v449_v23 }
  0x3b   : > { %788 = vmatpush3.msra.mxu0 %v460_v22 }
  0x3c   : > { %789 = vmatprep.subr.mxu0 %v459_v24 }
  0x3d   : > { %790 = vmatpush3.msra.mxu0 %v459_v24 }
  0x3e   : > { %791 = vmatprep.subr.mxu0 %v458_v25 }
  0x3f   : > { %792 = vmatpush3.msra.mxu0 %v458_v25 }
  0x40   : > { %793 = vmatprep.subr.mxu0 %v457_v26 }
  0x41   : > { %794 = vmatpush3.msra.mxu0 %v457_v26 }
  0x42   : > { %795 = vmatprep.subr.mxu0 %v456_v27 }
  0x43   : > { %796 = vmatpush3.msra.mxu0 %v456_v27 }
  0x44   : > { %797 = vmatprep.subr.mxu0 %v455_v28 }
  0x45   : > { %798 = vmatpush3.msra.mxu0 %v455_v28 }
  0x46   : > { %799 = vmatprep.subr.mxu0 %v454_v29 }
  0x47   : > { %800 = vmatpush3.msra.mxu0 %v454_v29 }
  0x48   : > { %801 = vmatprep.subr.mxu0 %v453_v30 }
  0x49   : > { %802 = vmatpush3.msra.mxu0 %v453_v30 }
  0x4a   : > { %803 = vmatprep.subr.mxu0 %v452_v31 }
  0x4b   : > { %804 = vmatpush3.msra.mxu0 %v452_v31 }
  0x4c   : > { %806 = vmatmul.mubr.msk.f32.vlgmr.msra.gmra.mxu0 %vm286_vm0, %v450_v32 }
  0xf9   : > { %v765_v33 = vpop.f32.mrf.mxu0  ;;  %v786_v34 = vpop.f32.mrf.mxu1 }
  0xfa   : > { %v446_v37 = vadd.f32 %v786_v34, %v765_v33 }
  0xfb   : > { %v359_v35 = vpop.f32.mrf.mxu0  ;;  %v440_v36 = vpop.f32.mrf.mxu1 }
  0xfc   : > { %v441_v40 = vadd.f32 %v440_v36, %v359_v35 }
 0x10c   : > { %v807_v38 = vpop.f32.mrf.mxu0 }
 0x10d   : > { %v543_v41 = vadd.f32 %v807_v38, %v446_v37 }
 0x10e   : > { %v533_v43 = vpop.f32.mrf.mxu0 }
 0x10f   : > { %v552_v44 = vmul.f32 %v704_v39, %v543_v41  ;;  %v542_v45 = vadd.f32 %v533_v43, %v441_v40 }
 0x111   : > { %v561_v46 = vadd.f32 %v705_v42, %v552_v44  ;;  %v551_v47 = vmul.f32 %v704_v39, %v542_v45 }
 0x113   : > { %v563_v48 = vmax.f32 %v561_v46, 0.0  ;;  %v560_v49 = vadd.f32 %v705_v42, %v551_v47 }
 0x115   : > { %565 = vst [vmem:[%s248_s7 + $0x8] sm:$0xff] %v563_v48  ;;  %v562_v50 = vmax.f32 %v560_v49, 0.0 }
 0x117   : > { %564 = vst [vmem:[%s248_s7] sm:$0xff] %v562_v50 }
 0x118   : > { %918 = shalt.err (!%p915_p3)
}
 0x119   : > { %s919_s24 = scalar_lea.hbm %s1128_s12, 256  ;;  %s923_s30 = scalar_lea.hbm %s1179_s4, 512 }
 0x11a   : > { %p920_p5 = scmp.ne.s32.totalorder %s1128_s12, %s919_s24  ;;  %p924_p9 = scmp.lt.s32.totalorder %s1128_s12, %s1179_s4 }
 0x11b   : > { %p925_p12 = scmp.lt.s32.totalorder %s923_s30, %s919_s24 }
 0x11c   : > { %p921_p6 = pnand %p920_p5, %p1058_p4 }
 0x11d   : > { %p926_p10 = por %p925_p12, %p924_p9 }
 0x11e   : > { %p922_p7 = pneg %p921_p6 }
 0x120   : > { %p927_p11 = pnand %p926_p10, %p922_p7 }
 0x122   : > { %930 = shalt.err (!%p927_p11)
}
 0x123   : > { %s991_s7 = smov 128   ;;  %s992_s9 = smov 8  }
 0x124   : > { %813 = dma.vmem_to_hbm [thread:$0]  (%p1058_p4), %s1123_s8, 256, %s1128_s12, %s1130_s13, %s991_s7, %s991_s7, %s992_s9  }
 0x125 PF: > { %p825_p13 = scmp.ge.s32.totalorder %s985_s20, 2  ;;  %s599_s10 = sand.u32 1, %s965_s15  }
 0x126   : > { %s600_s11 = scalar_lea.sflag [#allocation4], %s599_s10 }
 0x127   : > { %p820_p0 = pnand %p825_p13, %p1065_p8 }
 0x129   : > { %p821_p1 = pneg %p820_p0 }
 0x12b   : > { %960 = dma.done.wait (%p821_p1), %s600_s11, 256  }
 0x12c   : > { %962 = vsyncadd (%p821_p1), %s600_s11, 4294967040  ;;  %s18_s20 = sadd.s32 1, %s985_s20   ;;  %s1184_s15 = smov %s969_s16 }
 0x12d   : > { %p15_p2 = scmp.ge.s32.totalorder %s18_s20, 4   ;;  %s1185_s16 = smov %s973_s17 }
 0x12e   : > { %s1186_s17 = smov %s1071_s28  ;;  %s1187_s18 = smov %s981_s19 }
 0x12f   : > { %s1188_s19 = smov %s1190_s23  ;;  %17 = sbr.rel (!%p15_p2) target bundleno = 5 (0x5), region = 78 }
 0x134   :  { %605 = vsyncpa [#allocation3], 1 }
 0x135   :  { %607 = vsyncpa [#allocation3 + $0x1], 1 }
 0x136   :  { %608 = vsyncpa [#allocation4], 1 }
 0x137   :  { %610 = vsyncpa [#allocation4 + $0x1], 1 }

</bundles_post_ra>
